<compile_context>
chip_gen: v7x
topology: tpu7x:2x2x1
jax: 0.10.0
libtpu: 0.0.40
codegen_flags: <defaults>
</compile_context>

<pallas_src>
import jax
import jax.numpy as jnp
from jax.experimental import pallas as pl
from jax.experimental.pallas import tpu as pltpu


def _round_up(x: int, m: int) -> int:
    return (x + m - 1) // m * m


def _largest_divisor_tile(dim: int, cap: int, mult: int):
    """Largest t <= cap with t % mult == 0 and dim % t == 0; None if impossible."""
    cap = min(cap, dim)
    cap -= cap % mult
    t = cap
    while t >= mult:
        if dim % t == 0:
            return t
        t -= mult
    return None


def reward_criterion_kernel(seq_ref, w_ref, out_ref, o_ref, acc_ref):
    """Grid = (row_tiles, vocab_tiles); vocab is the trailing reduction axis."""
    k = pl.program_id(1)
    nk = pl.num_programs(1)
    v_tile = out_ref.shape[1]

    @pl.when(k == 0)
    def _init():
        acc_ref[...] = jnp.zeros_like(acc_ref)

    # Select-accumulate gather: at most one lane per row matches its token id,
    # so summing in the input dtype is exact.
    tile = out_ref[...]                                             # (rt, vt), input dtype
    v_iota = jax.lax.broadcasted_iota(jnp.int32, tile.shape, 1)     # lane index in tile
    local_id = seq_ref[...] - k * v_tile                            # (rt, 1)
    selected = jnp.where(v_iota == local_id, tile, 0.0)             # VALU select, input dtype
    partial = jnp.sum(selected, axis=1, keepdims=True)              # (rt, 1), XLU reduce
    acc_ref[...] += partial.astype(jnp.float32)

    @pl.when(k == nk - 1)
    def _finalize():
        o_ref[...] = acc_ref[...] * w_ref[...]                      # -logp * reward * mask


def reward_criterion(output, sequence, reward, *, row_tile=None, v_tile=None):
    """Pallas implementation of RewardCriterion.forward (returns scalar loss)."""
    B, T, V = output.shape
    sequence = sequence.astype(jnp.int32)
    reward = reward.astype(jnp.float32)

    itemsize = output.dtype.itemsize
    # Default tiles: ~4-8 MiB of log-probs per grid step (>=512-wide tiles reach
    # ~85% of HBM roofline; per-step overhead amortizes away).
    if row_tile is None:
        row_tile = 512 if itemsize <= 2 else 256
    if v_tile is None:
        v_tile = 4096 if itemsize <= 2 else 8192

    # --- O(B*T) mask / weight math stays in the wrapper ---------------------
    mask = jnp.concatenate(
        [jnp.ones((B, 1), jnp.float32),
         (sequence[:, :-1] > 0).astype(jnp.float32)],
        axis=1,
    )
    w = -(reward * mask)                       # (B, T)
    den = jnp.sum(mask)                        # >= B, never zero

    R = B * T
    out2d = output.reshape(R, V)               # keep original HBM dtype
    seq2d = sequence.reshape(R, 1)
    w2d = w.reshape(R, 1)

    # --- row tile: exact divisor of R, native sublane multiple --------------
    row_mult = {1: 32, 2: 16}.get(itemsize, 8)   # bf16 vregs are (16,128)
    rt = (_largest_divisor_tile(R, row_tile, row_mult)
          or _largest_divisor_tile(R, row_tile, 8))
    if rt is not None and R // rt < 2:
        # Prefer >= 2 row tiles so the "parallel" axis can use both v7x cores.
        rt = (_largest_divisor_tile(R, R // 2, row_mult)
              or _largest_divisor_tile(R, R // 2, 8)
              or rt)
    pad_rows = False
    if rt is None:
        if R <= max(row_tile, 1024):
            rt = R                              # full-dim block exception, no pad
        else:
            pad_rows = True                     # last resort
            rt = _round_up(min(row_tile, R), row_mult)
    R_pad = _round_up(R, rt) if pad_rows else R

    # --- vocab tile: exact divisor of V, lane multiple of 128 ---------------
    # Cap the per-buffer footprint at ~20 MiB (=> <=40 MiB double-buffered),
    # safe under v7x's 64 MiB/TC physical VMEM; plenty of headroom on v5e/v6e.
    per_buf_budget = 20 << 20
    vt_cap = max(128, min(v_tile, per_buf_budget // max(1, rt * itemsize)))
    vt = _largest_divisor_tile(V, vt_cap, 128)
    pad_vocab = False
    if vt is None:
        if rt * V * itemsize <= per_buf_budget:
            vt = V                              # full-dim block exception, no pad
        else:
            pad_vocab = True                    # last resort
            vt = _round_up(min(vt_cap, V), 128)
    V_pad = _round_up(V, vt) if pad_vocab else V

    # --- last-resort padding only (avoided on typical shapes) ---------------
    if pad_vocab:
        out2d = jnp.pad(out2d, ((0, 0), (0, V_pad - V)))
    if pad_rows:
        out2d = jnp.pad(out2d, ((0, R_pad - R), (0, 0)))
        seq2d = jnp.pad(seq2d, ((0, R_pad - R), (0, 0)), constant_values=-1)
        w2d = jnp.pad(w2d, ((0, R_pad - R), (0, 0)))

    grid = (R_pad // rt, V_pad // vt)

    tile_bytes = rt * vt * itemsize
    vmem_need = 2 * tile_bytes + 2 * 3 * rt * 4 + rt * 4   # dbl-buffered in/out + scratch
    vmem_limit = int(min(48 << 20, max(32 << 20, vmem_need + (2 << 20))))

    bytes_accessed = (
        R_pad * V_pad * itemsize                 # streamed log-probs
        + R_pad * (4 + 4)                        # token ids + weights
        + R_pad * 4                              # per-row output
    )

    per_row = pl.pallas_call(
        reward_criterion_kernel,
        out_shape=jax.ShapeDtypeStruct((R_pad, 1), jnp.float32),
        grid_spec=pltpu.PrefetchScalarGridSpec(
            num_scalar_prefetch=0,
            grid=grid,
            in_specs=[
                pl.BlockSpec((rt, 1), lambda i, k: (i, 0)),    # token ids
                pl.BlockSpec((rt, 1), lambda i, k: (i, 0)),    # -(reward*mask)
                pl.BlockSpec((rt, vt), lambda i, k: (i, k)),   # log-probs tile
            ],
            out_specs=pl.BlockSpec((rt, 1), lambda i, k: (i, 0)),
            scratch_shapes=[pltpu.VMEM((rt, 1), jnp.float32)],
        ),
        compiler_params=pltpu.CompilerParams(
            dimension_semantics=("parallel", "arbitrary"),
            vmem_limit_bytes=vmem_limit,
        ),
        cost_estimate=pl.CostEstimate(
            flops=2 * R_pad * V_pad,
            transcendentals=0,
            bytes_accessed=bytes_accessed,
        ),
    )(seq2d, w2d, out2d)

    # Tiny O(R) epilogue (padded rows, if any, contribute exactly zero).
    return jnp.sum(per_row) / den


def reward_criterion_ref(output, sequence, reward):
    """Plain-JAX reference mirroring the PyTorch forward exactly."""
    out_f32 = output.astype(jnp.float32)
    gathered = jnp.take_along_axis(out_f32, sequence[:, :, None], axis=2)[:, :, 0]
    mask_raw = (sequence > 0).astype(jnp.float32)
    mask = jnp.concatenate(
        [jnp.ones((sequence.shape[0], 1), jnp.float32), mask_raw[:, :-1]], axis=1
    )
    loss = -gathered.reshape(-1) * reward.astype(jnp.float32).reshape(-1) * mask.reshape(-1)
    return jnp.sum(loss) / jnp.sum(mask)


if __name__ == "__main__":
    key = jax.random.PRNGKey(0)

    # --- test 1: small f32; full-V block (V=32), 2 row tiles ----------------
    B, T, V = 2, 8, 32
    k1, k2, k3 = jax.random.split(key, 3)
    output = jax.random.normal(k1, (B, T, V), dtype=jnp.float32)
    sequence = jax.random.randint(k2, (B, T), 0, V, dtype=jnp.int32)
    sequence = sequence.at[0, 5].set(0).at[1, 3].set(0)   # exercise the mask path
    reward = jax.random.normal(k3, (B, T), dtype=jnp.float32)

    loss = reward_criterion(output, sequence, reward)
    jax.block_until_ready(loss)
    loss_ref = reward_criterion_ref(output, sequence, reward)
    assert jnp.allclose(loss, loss_ref, rtol=1e-5, atol=1e-5), (loss, loss_ref)

    # --- test 2: bf16, V not a multiple of 128 -> full-V block, no padding --
    B2, T2, V2 = 3, 16, 300
    k4, k5, k6 = jax.random.split(jax.random.PRNGKey(1), 3)
    output2 = jax.random.normal(k4, (B2, T2, V2), dtype=jnp.bfloat16)
    sequence2 = jax.random.randint(k5, (B2, T2), 0, V2, dtype=jnp.int32)
    sequence2 = sequence2.at[0, 2].set(0).at[2, 10].set(0)
    reward2 = jax.random.normal(k6, (B2, T2), dtype=jnp.float32)

    loss2 = reward_criterion(output2, sequence2, reward2)
    jax.block_until_ready(loss2)
    loss2_ref = reward_criterion_ref(output2, sequence2, reward2)
    assert jnp.allclose(loss2, loss2_ref, rtol=1e-5, atol=1e-5), (loss2, loss2_ref)

    # --- test 3: bf16, multi-step vocab reduction (grid = 2 x 5) ------------
    B3, T3, V3 = 2, 16, 640
    k7, k8, k9 = jax.random.split(jax.random.PRNGKey(2), 3)
    output3 = jax.random.normal(k7, (B3, T3, V3), dtype=jnp.bfloat16)
    sequence3 = jax.random.randint(k8, (B3, T3), 0, V3, dtype=jnp.int32)
    sequence3 = sequence3.at[1, 7].set(0)
    reward3 = jax.random.normal(k9, (B3, T3), dtype=jnp.float32)

    loss3 = reward_criterion(output3, sequence3, reward3, row_tile=16, v_tile=128)
    jax.block_until_ready(loss3)
    loss3_ref = reward_criterion_ref(output3, sequence3, reward3)
    assert jnp.allclose(loss3, loss3_ref, rtol=1e-5, atol=1e-5), (loss3, loss3_ref)

    print("KERNEL_OK")
</pallas_src>

<mosaic_0001>
module attributes {stable_mosaic.version = 11 : i64} {
  func.func @reward_criterion_kernel(%arg0: i32, %arg1: i32, %arg2: memref<8x1xi32, #tpu.memory_space<vmem>>, %arg3: memref<8x1xf32, #tpu.memory_space<vmem>>, %arg4: memref<8x32xf32, #tpu.memory_space<vmem>>, %arg5: memref<8x1xf32, #tpu.memory_space<vmem>>, %arg6: memref<8x1xf32, #tpu.memory_space<vmem>>) attributes {dimension_semantics = [#tpu.dimension_semantics<parallel>, #tpu.dimension_semantics<arbitrary>], iteration_bounds = array<i64: 2, 1>, scalar_prefetch = 0 : i64, scratch_operands = 1 : i64, tpu.core_type = #tpu.core_type<tc>, window_params = [{transform_indices = @transform_0, window_bounds = array<i64: 8, 1>}, {transform_indices = @transform_1, window_bounds = array<i64: 8, 1>}, {transform_indices = @transform_2, window_bounds = array<i64: 8, 32>}, {transform_indices = @transform_3, window_bounds = array<i64: 8, 1>}]} {
    %c0_i32 = arith.constant 0 : i32
    %0 = arith.cmpi eq, %arg1, %c0_i32 : i32
    %1 = arith.extui %0 : i1 to i32
    %c0_i32_0 = arith.constant 0 : i32
    %2 = arith.cmpi ne, %1, %c0_i32_0 : i32
    scf.if %2 {
      %cst_11 = arith.constant 0.000000e+00 : f32
      %21 = vector.broadcast %cst_11 : f32 to vector<8x1xf32>
      %c0_12 = arith.constant 0 : index
      %c0_13 = arith.constant 0 : index
      %22 = vector.load %arg6[%c0_12, %c0_13] : memref<8x1xf32, #tpu.memory_space<vmem>>, vector<8x1xf32>
      tpu.vector_store %arg6[%c0_12, %c0_13], %21 {strides = array<i32>} : memref<8x1xf32, #tpu.memory_space<vmem>>, vector<8x1xf32>,
    } else {
    }
    %c0 = arith.constant 0 : index
    %c0_1 = arith.constant 0 : index
    %3 = vector.load %arg4[%c0, %c0_1] : memref<8x32xf32, #tpu.memory_space<vmem>>, vector<8x32xf32>
    %4 = tpu.iota {dimensions = array<i32: 1>} : vector<8x32xi32>
    %c0_2 = arith.constant 0 : index
    %c0_3 = arith.constant 0 : index
    %5 = vector.load %arg2[%c0_2, %c0_3] : memref<8x1xi32, #tpu.memory_space<vmem>>, vector<8x1xi32>
    %c32_i32 = arith.constant 32 : i32
    %6 = arith.muli %arg1, %c32_i32 : i32
    %7 = vector.broadcast %6 : i32 to vector<8x1xi32>
    %8 = arith.subi %5, %7 : vector<8x1xi32>
    %9 = vector.broadcast %8 : vector<8x1xi32> to vector<8x32xi32>
    %10 = arith.cmpi eq, %4, %9 : vector<8x32xi32>
    %cst = arith.constant 0.000000e+00 : f32
    %11 = vector.broadcast %cst : f32 to vector<8x32xf32>
    %12 = arith.select %10, %3, %11 : vector<8x32xi1>, vector<8x32xf32>
    %cst_4 = arith.constant dense<0.000000e+00> : vector<8xf32>
    %13 = vector.multi_reduction <add>, %12, %cst_4 [1] : vector<8x32xf32> to vector<8xf32>
    %14 = vector.shape_cast %13 : vector<8xf32> to vector<8x1xf32>
    %c0_5 = arith.constant 0 : index
    %c0_6 = arith.constant 0 : index
    %15 = vector.load %arg6[%c0_5, %c0_6] : memref<8x1xf32, #tpu.memory_space<vmem>>, vector<8x1xf32>
    %16 = arith.addf %15, %14 : vector<8x1xf32>
    %c0_7 = arith.constant 0 : index
    %c0_8 = arith.constant 0 : index
    %17 = vector.load %arg6[%c0_7, %c0_8] : memref<8x1xf32, #tpu.memory_space<vmem>>, vector<8x1xf32>
    tpu.vector_store %arg6[%c0_7, %c0_8], %16 {strides = array<i32>} : memref<8x1xf32, #tpu.memory_space<vmem>>, vector<8x1xf32>,
    %c0_i32_9 = arith.constant 0 : i32
    %18 = arith.cmpi eq, %arg1, %c0_i32_9 : i32
    %19 = arith.extui %18 : i1 to i32
    %c0_i32_10 = arith.constant 0 : i32
    %20 = arith.cmpi ne, %19, %c0_i32_10 : i32
    scf.if %20 {
      %c0_11 = arith.constant 0 : index
      %c0_12 = arith.constant 0 : index
      %21 = vector.load %arg6[%c0_11, %c0_12] : memref<8x1xf32, #tpu.memory_space<vmem>>, vector<8x1xf32>
      %c0_13 = arith.constant 0 : index
      %c0_14 = arith.constant 0 : index
      %22 = vector.load %arg3[%c0_13, %c0_14] : memref<8x1xf32, #tpu.memory_space<vmem>>, vector<8x1xf32>
      %23 = arith.mulf %21, %22 : vector<8x1xf32>
      %c0_15 = arith.constant 0 : index
      %c0_16 = arith.constant 0 : index
      %24 = vector.load %arg5[%c0_15, %c0_16] : memref<8x1xf32, #tpu.memory_space<vmem>>, vector<8x1xf32>
      tpu.vector_store %arg5[%c0_15, %c0_16], %23 {strides = array<i32>} : memref<8x1xf32, #tpu.memory_space<vmem>>, vector<8x1xf32>,
    } else {
    }
    return
  }
  func.func @transform_0(%arg0: i32, %arg1: i32) -> (i32, i32) {
    %c0_i32 = arith.constant 0 : i32
    %c0_i32_0 = arith.constant 0 : i32
    return %arg0, %c0_i32 : i32, i32
  }
  func.func @transform_1(%arg0: i32, %arg1: i32) -> (i32, i32) {
    %c0_i32 = arith.constant 0 : i32
    %c0_i32_0 = arith.constant 0 : i32
    return %arg0, %c0_i32 : i32, i32
  }
  func.func @transform_2(%arg0: i32, %arg1: i32) -> (i32, i32) {
    %c0_i32 = arith.constant 0 : i32
    return %arg0, %arg1 : i32, i32
  }
  func.func @transform_3(%arg0: i32, %arg1: i32) -> (i32, i32) {
    %c0_i32 = arith.constant 0 : i32
    %c0_i32_0 = arith.constant 0 : i32
    return %arg0, %c0_i32 : i32, i32
  }
}

</mosaic_0001>

<bundles_post_ra>
// kernel: tpu_custom_call.1
= control target key start
LH: loop header
LB: loop body
LE: loop exit
PB: predicated region body
PF: predicated region fallthrough
CT: control target
= control target key end

     0   :  { %s428_s12 = smov 0   ;;  %s430_s13 = smov 0   ;;  %s470_s0 = inlined_call_operand.vmem [shape: s32[16,1], index: 0, kind: input, shape index: {}]   ;;  %s471_s1 = inlined_call_operand.vmem [shape: f32[16,1], index: 1, kind: input, shape index: {}]   ;;  %s472_s2 = inlined_call_operand.vmem [shape: f32[16,32], index: 2, kind: input, shape index: {}]   ;;  %s473_s3 = inlined_call_operand.vmem [shape: f32[16,1], index: 3, kind: output, shape index: {}]  }
   0x1   :  { %s432_s14 = smov 0  }
   0x2 LB: > { %s25_s15 = sadd.s32 1, %s400_s13  ;;  %p348_p0 = scmp.ge.s32.totalorder %s404_s14, 1  ;;  %s404_s14 = sphi %s432_s14, %s13_s14   ;;  %s400_s13 = sphi %s430_s13, %s475_s13   ;;  %s396_s12 = sphi %s428_s12, %s474_s12  }
   0x3   : > { %p27_p1 = scmp.ge.s32.totalorder %s25_s15, 2  ;;  %p171_p2 = scmp.lt.s32.totalorder %s404_s14, 3 }
   0x5   : > { %s477_s15 = smov (%p27_p1, %s25_s15), 0  ;;  %p172_p3 = pnand %p348_p0, %p171_p2 }
   0x6   : > { %p204_p4 = scmp.lt.s32.totalorder (!%p172_p3), %s396_s12, 1  ;;  %v406_v0 = vmov (!%p172_p3), 0   ;;  %vm227_vm0 = vcmask (!%p172_p3), 7168   ;;  %v407_v2 = vmov (!%p172_p3), 0.0   ;;  %v230_v3 = vlaneseq (!%p172_p3) }
   0x7   : > { %175 = sbr.rel (%p172_p3) target bundleno = 304 (0x130), region = 32  ;;  %381 = vset.pattern.permute.xlu0 (!%p172_p3), %v406_v0  ;;  %228 = vst.msk [vmem:[#allocation2] sm:$0xff] (!%p172_p3), %vm227_vm0, %v407_v2  ;;  %vm241_vm1 = vcmask (!%p172_p3), 261120  }
   0x8   : > { %v231_v4 = vand.u32 (!%p172_p3), 127, %v230_v3 }
   0xe   : > { %s479_s12 = smov (!%p204_p4, %s396_s12), 1  ;;  %v245_v9 = vld [vmem:[#allocation2] sm:$0xff] }
   0xf   : > { %s349_s16 = sshll.u32 %s479_s12, 3 }
  0x10   : > { %s207_s19 = scalar_lea.vmem %s470_s0, %s349_s16  ;;  %s218_s22 = scalar_lea.vmem %s472_s2, %s349_s16 }
  0x11   : > { %v232_v1 = vld [vmem:[%s207_s19] sm:$0xff]  ;;  %s211_s25 = scalar_lea.vmem %s471_s1, %s349_s16  ;;  %s222_s28 = scalar_lea.vmem %s473_s3, %s349_s16 }
  0x12   : > { %237 = vperm.xlu0 %381, %v232_v1   ;;  %v229_v5 = vld [vmem:[%s218_s22] sm:$0xff] }
  0x13   : > { %v253_v12 = vld [vmem:[%s211_s25] sm:$0xff] }
  0x91   : > { %v238_v6 = vpop.permute.xlu0 %237 }
  0x92   : > { %vm239_vm2 = vcmp.eq.s32.totalorder %v231_v4, %v238_v6 }
  0x93   : > { %v240_v7 = vsel %vm239_vm2, %v229_v5, 0.0 }
  0x94   : > { %v242_v8 = vsel %vm241_vm1, %v240_v7, 0.0 }
  0x95   : > { %243 = vadd.xlane.f32.xlu0 %v242_v8 }
 0x122   : > { %v244_v10 = vpop.xlane.xlu0 %243 }
 0x123   : > { %v246_v11 = vadd.f32 %v245_v9, %v244_v10 }
 0x125   : > { %248 = vst.msk [vmem:[#allocation2] sm:$0xff] %vm227_vm0, %v246_v11 }
 0x12c   : > { %v252_v13 = vld [vmem:[#allocation2] sm:$0xff] }
 0x12d   : > { %v254_v14 = vmul.f32 %v253_v12, %v252_v13 }
 0x12f   : > { %255 = vst.msk [vmem:[%s222_s28] sm:$0xff] %vm227_vm0, %v254_v14 }
 0x130 PF: > { %s13_s14 = sadd.s32 1, %s404_s14   ;;  %s474_s12 = smov %s400_s13 }
 0x131   : > { %p10_p5 = scmp.ge.s32.totalorder %s13_s14, 4   ;;  %s475_s13 = smov %s477_s15 }
 0x133   :  { %12 = sbr.rel (!%p10_p5) target bundleno = 2 (0x2), region = 76 }

</bundles_post_ra>
